<compile_context>
chip_gen: v7x
topology: tpu7x:2x2x1
jax: 0.10.0
libtpu: 0.0.40
codegen_flags: <defaults>
</compile_context>

<pallas_src>
import functools

import jax
import jax.numpy as jnp
import numpy as np
from jax import lax
from jax.experimental import pallas as pl
from jax.experimental.pallas import tpu as pltpu

LANE = 128     # TPU lane width (last dim)
SUBLANE = 8    # f32 sublane tile (second-to-last dim)


def _round_up(x, m):
    return ((x + m - 1) // m) * m


def _object_embedding_kernel(tgt_ref, w_ref, bias_ref, out_ref):
    # tgt_ref : (Bp, Kp)  int32  flat target ids (j*V + x[b,j]) repeated per
    #                            slot; -1 for invalid/padded positions.
    # w_ref   : (Kp, Cp)  f32    embedding table folded into FC weight.
    # bias_ref: (1,  Cp)  f32    FC bias, zero-padded to lane width.
    # out_ref : (Bp, Cp)  f32
    Bp, Kp = tgt_ref.shape
    pos = lax.broadcasted_iota(jnp.int32, (Bp, Kp), 1)          # column index
    one_hot = (pos == tgt_ref[...]).astype(jnp.float32)         # (Bp, Kp), O ones/row
    out_ref[...] = (
        jnp.dot(one_hot, w_ref[...], preferred_element_type=jnp.float32)
        + bias_ref[...]
    )


def prepare_params(emb_table, fc_weight, fc_bias, num_objects):
    """One-time, weight-only prep: fold the embedding table into the FC weight.

    Returns:
      combined: (Kp, Cp) f32, combined[j*V+v, c] = sum_e emb[v,e] * W[c, j*E+e]
                (zero rows/cols for padding).
      bias_pad: (1, Cp)  f32.
    Call once at parameter load; do NOT pay this per forward call.
    """
    V, E = emb_table.shape
    C, OE = fc_weight.shape
    O = num_objects
    assert OE == O * E, "fc_weight in_features must equal num_objects * embedding_dim"

    K = O * V
    Kp = _round_up(K, LANE)
    Cp = _round_up(C, LANE)

    w3 = fc_weight.astype(jnp.float32).reshape(C, O, E)                  # (C, O, E)
    comb = jnp.einsum(
        "ve,coe->ovc",
        emb_table.astype(jnp.float32),
        w3,
        precision=lax.Precision.HIGHEST,
    )                                                                    # (O, V, C)
    comb = comb.reshape(K, C)
    comb = jnp.pad(comb, ((0, Kp - K), (0, Cp - C)))                     # (Kp, Cp)
    bias_pad = jnp.pad(fc_bias.astype(jnp.float32), (0, Cp - C)).reshape(1, Cp)
    return comb, bias_pad


@functools.partial(
    jax.jit, static_argnames=("num_embeddings", "num_classes", "num_objects")
)
def object_embedding_forward(x_idx, combined_w, bias_pad, *,
                             num_embeddings, num_classes, num_objects):
    """x_idx: (B, O) int ids. combined_w/bias_pad from prepare_params()."""
    B, O = x_idx.shape
    assert O == num_objects
    V = num_embeddings
    Kp, Cp = combined_w.shape
    Bp = _round_up(max(B, SUBLANE), SUBLANE)

    # Tiny per-call index prep (fused XLA elementwise, a few KB of int32):
    # flat target id for object slot j is j*V + x[b, j]; out-of-range ids -> -1
    # (match nothing => zero embedding row, documented semantic difference from
    # PyTorch which raises).
    idx = x_idx.astype(jnp.int32)
    valid = (idx >= 0) & (idx < V)
    offs = jnp.arange(O, dtype=jnp.int32)[None, :] * V
    g = jnp.where(valid, idx + offs, -1)                                 # (B, O)
    g_exp = jnp.repeat(g, V, axis=1)                                     # (B, O*V)
    g_exp = jnp.pad(
        g_exp, ((0, Bp - B), (0, Kp - O * V)), constant_values=-1
    )                                                                    # (Bp, Kp)

    out = pl.pallas_call(
        _object_embedding_kernel,
        out_shape=jax.ShapeDtypeStruct((Bp, Cp), jnp.float32),
        in_specs=[
            pl.BlockSpec(memory_space=pltpu.MemorySpace.VMEM),   # targets (Bp, Kp)
            pl.BlockSpec(memory_space=pltpu.MemorySpace.VMEM),   # combined (Kp, Cp)
            pl.BlockSpec(memory_space=pltpu.MemorySpace.VMEM),   # bias (1, Cp)
        ],
        out_specs=pl.BlockSpec(memory_space=pltpu.MemorySpace.VMEM),
    )(g_exp, combined_w, bias_pad)

    return out[:B, :num_classes]   # drop sublane / lane padding


if __name__ == "__main__":
    # Module hyper-parameters (small, consistent with the forward pass).
    num_embeddings = 50
    embedding_dim = 32
    num_classes = 8
    num_objects_per_frame = 10
    batch = 2

    key = jax.random.PRNGKey(0)
    k_emb, k_w, k_b, k_x = jax.random.split(key, 4)

    # Deterministic synthetic parameters (nn.Embedding ~ N(0,1); nn.Linear
    # uniform(-1/sqrt(fan_in), 1/sqrt(fan_in))).
    emb_table = jax.random.normal(k_emb, (num_embeddings, embedding_dim), jnp.float32)
    fan_in = embedding_dim * num_objects_per_frame
    bound = 1.0 / np.sqrt(fan_in)
    fc_weight = jax.random.uniform(k_w, (num_classes, fan_in), jnp.float32,
                                   minval=-bound, maxval=bound)
    fc_bias = jax.random.uniform(k_b, (num_classes,), jnp.float32,
                                 minval=-bound, maxval=bound)

    # Input: integer object ids per frame, shape (B, O).
    x = jax.random.randint(k_x, (batch, num_objects_per_frame), 0,
                           num_embeddings, dtype=jnp.int32)

    # One-time weight prep (hoisted out of the per-call path).
    combined_w, bias_pad = prepare_params(
        emb_table, fc_weight, fc_bias, num_objects_per_frame)
    combined_w, bias_pad = jax.block_until_ready((combined_w, bias_pad))

    out = object_embedding_forward(
        x, combined_w, bias_pad,
        num_embeddings=num_embeddings,
        num_classes=num_classes,
        num_objects=num_objects_per_frame,
    )
    out = jax.block_until_ready(out)

    # Float64 numpy reference (same math as the PyTorch forward), independent
    # of TPU default matmul precision.
    emb_np = np.asarray(emb_table, dtype=np.float64)
    w_np = np.asarray(fc_weight, dtype=np.float64)
    b_np = np.asarray(fc_bias, dtype=np.float64)
    x_np = np.asarray(x)
    ref = emb_np[x_np].reshape(batch, -1) @ w_np.T + b_np

    np.testing.assert_allclose(np.asarray(out), ref, rtol=1e-5, atol=1e-4)

    print("KERNEL_OK")
</pallas_src>

<mosaic_0001>
module attributes {stable_mosaic.version = 11 : i64} {
  func.func @_object_embedding_kernel(%arg0: memref<8x512xi32, #tpu.memory_space<vmem>>, %arg1: memref<512x128xf32, #tpu.memory_space<vmem>>, %arg2: memref<1x128xf32, #tpu.memory_space<vmem>>, %arg3: memref<8x128xf32, #tpu.memory_space<vmem>>) attributes {dimension_semantics = [], scalar_prefetch = 0 : i64, scratch_operands = 0 : i64, tpu.core_type = #tpu.core_type<tc>} {
    %0 = tpu.iota {dimensions = array<i32: 1>} : vector<8x512xi32>
    %c0 = arith.constant 0 : index
    %c0_0 = arith.constant 0 : index
    %1 = vector.load %arg0[%c0, %c0_0] : memref<8x512xi32, #tpu.memory_space<vmem>>, vector<8x512xi32>
    %2 = arith.cmpi eq, %0, %1 : vector<8x512xi32>
    %3 = arith.extui %2 : vector<8x512xi1> to vector<8x512xi32>
    %4 = arith.sitofp %3 : vector<8x512xi32> to vector<8x512xf32>
    %c0_1 = arith.constant 0 : index
    %c0_2 = arith.constant 0 : index
    %5 = vector.load %arg1[%c0_1, %c0_2] : memref<512x128xf32, #tpu.memory_space<vmem>>, vector<512x128xf32>
    %cst = arith.constant dense<0.000000e+00> : vector<8x128xf32>
    %6 = tpu.matmul %4, %5, %cst {dimension_numbers = #tpu.dot_dimension_numbers<[1], [0], [0], [1], [0, 0, 1, 1], [], []>} : vector<8x512xf32>, vector<512x128xf32>, vector<8x128xf32> -> vector<8x128xf32>
    %c0_3 = arith.constant 0 : index
    %c0_4 = arith.constant 0 : index
    %7 = vector.load %arg2[%c0_3, %c0_4] : memref<1x128xf32, #tpu.memory_space<vmem>>, vector<1x128xf32>
    %8 = vector.broadcast %7 : vector<1x128xf32> to vector<8x128xf32>
    %9 = arith.addf %6, %8 : vector<8x128xf32>
    %c0_5 = arith.constant 0 : index
    %c0_6 = arith.constant 0 : index
    %10 = vector.load %arg3[%c0_5, %c0_6] : memref<8x128xf32, #tpu.memory_space<vmem>>, vector<8x128xf32>
    tpu.vector_store %arg3[%c0_5, %c0_6], %9 {strides = array<i32>} : memref<8x128xf32, #tpu.memory_space<vmem>>, vector<8x128xf32>,
    return
  }
}

</mosaic_0001>

<bundles_post_ra>
// kernel: object_embedding_forward.1
= control target key start
LH: loop header
LB: loop body
LE: loop exit
PB: predicated region body
PF: predicated region fallthrough
CT: control target
= control target key end

     0   :  { %8 = vsyncpa [#allocation3], 0  ;;  %s437_s12 = smov [#allocation2]   ;;  %s497_s0 = inlined_call_operand.vmem [shape: s32[8,512], index: 0, kind: input, shape index: {}]   ;;  %s498_s1 = inlined_call_operand.hbm [shape: f32[512,128], index: 1, kind: input, shape index: {}]   ;;  %s499_s2 = inlined_call_operand.vmem [shape: f32[1,128], index: 2, kind: input, shape index: {}]   ;;  %s500_s3 = inlined_call_operand.vmem [shape: f32[8,128], index: 3, kind: output, shape index: {}]  }
   0x1   :  { %s16_s13 = sshll.u32 %s437_s12, 4  ;;  %s413_s16 = scalar_lea.hbm %s498_s1, 8192  ;;  %s17_s13 = int_to_ptr.vmem [resolvable:$true] %s16_s13 }
   0x2   :  { %p414_p0 = scmp.ne.s32.totalorder %s498_s1, %s413_s16  ;;  %p417_p1 = scmp.lt.u32.totalorder %s413_s16, %s498_s1 }
   0x4   :  { %p419_p2 = pnand %p417_p1, %p414_p0 }
   0x6   :  { %422 = shalt.err (!%p419_p2)
}
   0x7   :  { %s423_s21 = scalar_lea.vmem %s17_s13, 8192  ;;  %p428_p4 = scmp.lt.s32.totalorder %s17_s13, %s17_s13 }
   0x8   :  { %p424_p3 = scmp.ne.s32.totalorder %s17_s13, %s423_s21  ;;  %p429_p5 = scmp.lt.s32.totalorder %s423_s21, %s423_s21 }
   0xa   :  { %p430_p6 = por %p429_p5, %p428_p4 }
   0xc   :  { %p431_p7 = pnand %p430_p6, %p424_p3 }
   0xe   :  { %434 = shalt.err (!%p431_p7)
}
   0xf   :  { %s438_s22 = smov 128   ;;  %s439_s23 = smov 8  }
  0x10   :  { %22 = dma.hbm_to_vmem [thread:$0]  %s498_s1, 8192, %s17_s13, [#allocation3], %s438_s22, %s438_s22, %s439_s23  }
  0x11   :  { %435 = dma.done.wait [#allocation3], 8192  }
  0x12   :  { %436 = vsyncadd [#allocation3], 4294959104  ;;  %v65_v0 = vld [vmem:[#allocation2 + $0x80] sm:$0xff]  ;;  %v66_v1 = vld [vmem:[#allocation2 + $0x88] sm:$0xff]  ;;  %v28_v47 = vlaneseq }
  0x13   :  { %v49_v2 = vld [vmem:[#allocation2] sm:$0xff]  ;;  %v345_v3 = vpack.c.bf16 %v66_v1, %v65_v0  ;;  %v50_v4 = vld [vmem:[#allocation2 + $0x8] sm:$0xff]  ;;  %v67_v11 = vld [vmem:[#allocation2 + $0x90] sm:$0xff] }
  0x14   :  { %v97_v5 = vld [vmem:[#allocation2 + $0x180] sm:$0xff]  ;;  %v98_v6 = vld [vmem:[#allocation2 + $0x188] sm:$0xff]  ;;  %v347_v7 = vpack.c.bf16 %v50_v4, %v49_v2  ;;  %v68_v13 = vld [vmem:[#allocation2 + $0x98] sm:$0xff]  ;;  %v473_v61 = vand.u32 127, %v28_v47 }
  0x15   :  { %v377_v8 = vpack.c.bf16 %v98_v6, %v97_v5  ;;  %v81_v9 = vld [vmem:[#allocation2 + $0x100] sm:$0xff]  ;;  %v82_v10 = vld [vmem:[#allocation2 + $0x108] sm:$0xff]  ;;  %346 = vmatprep.subr.bf16.mxu0 %v345_v3  ;;  %v51_v14 = vld [vmem:[#allocation2 + $0x10] sm:$0xff]  ;;  %v349_v16 = vpack.c.bf16 %v68_v13, %v67_v11 }
  0x16   :  { %v379_v12 = vpack.c.bf16 %v82_v10, %v81_v9  ;;  %v52_v15 = vld [vmem:[#allocation2 + $0x18] sm:$0xff]  ;;  %348 = vmatpush3.bf16.msra.mxu0 %v347_v7  ;;  %v99_v18 = vld [vmem:[#allocation2 + $0x190] sm:$0xff]  ;;  %v69_v23 = vld [vmem:[#allocation2 + $0xa0] sm:$0xff]  ;;  %v30_v10 = vadd.s32 128, %v473_v61  ;;  %v32_v13 = vadd.s32 384, %v473_v61 }
  0x17   :  { %378 = vmatprep.subr.bf16.mxu1 %v377_v8  ;;  %v351_v17 = vpack.c.bf16 %v52_v15, %v51_v14  ;;  %v100_v19 = vld [vmem:[#allocation2 + $0x198] sm:$0xff]  ;;  %v83_v20 = vld [vmem:[#allocation2 + $0x110] sm:$0xff]  ;;  %v70_v24 = vld [vmem:[#allocation2 + $0xa8] sm:$0xff]  ;;  %350 = vmatprep.subr.bf16.mxu0 %v349_v16 }
  0x18   :  { %380 = vmatpush3.bf16.msra.mxu1 %v379_v12  ;;  %v381_v21 = vpack.c.bf16 %v100_v19, %v99_v18  ;;  %v84_v22 = vld [vmem:[#allocation2 + $0x118] sm:$0xff]  ;;  %v353_v26 = vpack.c.bf16 %v70_v24, %v69_v23  ;;  %v53_v27 = vld [vmem:[#allocation2 + $0x20] sm:$0xff]  ;;  %v54_v28 = vld [vmem:[#allocation2 + $0x28] sm:$0xff] }
  0x19   :  { %v383_v25 = vpack.c.bf16 %v84_v22, %v83_v20  ;;  %v101_v29 = vld [vmem:[#allocation2 + $0x1a0] sm:$0xff]  ;;  %v102_v30 = vld [vmem:[#allocation2 + $0x1a8] sm:$0xff]  ;;  %v355_v33 = vpack.c.bf16 %v54_v28, %v53_v27  ;;  %v71_v35 = vld [vmem:[#allocation2 + $0xb0] sm:$0xff]  ;;  %v440_v28 = vmov 1.0  }
  0x1a   :  { %382 = vmatprep.subr.bf16.mxu1 %v381_v21  ;;  %v85_v31 = vld [vmem:[#allocation2 + $0x120] sm:$0xff]  ;;  %v86_v32 = vld [vmem:[#allocation2 + $0x128] sm:$0xff]  ;;  %352 = vmatpush3.bf16.msra.mxu0 %v351_v17  ;;  %v385_v34 = vpack.c.bf16 %v102_v30, %v101_v29  ;;  %v72_v36 = vld [vmem:[#allocation2 + $0xb8] sm:$0xff] }
  0x1b   :  { %v55_v37 = vld [vmem:[#allocation2 + $0x30] sm:$0xff]  ;;  %354 = vmatprep.subr.bf16.mxu0 %v353_v26  ;;  %v387_v38 = vpack.c.bf16 %v86_v32, %v85_v31  ;;  %v357_v39 = vpack.c.bf16 %v72_v36, %v71_v35  ;;  %v56_v40 = vld [vmem:[#allocation2 + $0x38] sm:$0xff]  ;;  %v73_v46 = vld [vmem:[#allocation2 + $0xc0] sm:$0xff] }
  0x1c   :  { %384 = vmatpush3.bf16.msra.mxu1 %v383_v25  ;;  %v103_v41 = vld [vmem:[#allocation2 + $0x1b0] sm:$0xff]  ;;  %v104_v42 = vld [vmem:[#allocation2 + $0x1b8] sm:$0xff]  ;;  %v74_v48 = vld [vmem:[#allocation2 + $0xc8] sm:$0xff]  ;;  %v359_v49 = vpack.c.bf16 %v56_v40, %v55_v37  ;;  %v31_v40 = vadd.s32 256, %v473_v61 }
  0x1d   :  { %386 = vmatprep.subr.bf16.mxu1 %v385_v34  ;;  %v389_v43 = vpack.c.bf16 %v104_v42, %v103_v41  ;;  %v87_v44 = vld [vmem:[#allocation2 + $0x130] sm:$0xff]  ;;  %v88_v45 = vld [vmem:[#allocation2 + $0x138] sm:$0xff]  ;;  %v105_v50 = vld [vmem:[#allocation2 + $0x1c0] sm:$0xff]  ;;  %v361_v53 = vpack.c.bf16 %v74_v48, %v73_v46 }
  0x1e   :  { %356 = vmatpush3.bf16.msra.mxu0 %v355_v33  ;;  %v106_v51 = vld [vmem:[#allocation2 + $0x1c8] sm:$0xff]  ;;  %v391_v52 = vpack.c.bf16 %v88_v45, %v87_v44  ;;  %v57_v54 = vld [vmem:[#allocation2 + $0x40] sm:$0xff]  ;;  %v75_v59 = vld [vmem:[#allocation2 + $0xd0] sm:$0xff] }
  0x1f   :  { %358 = vmatprep.subr.bf16.mxu0 %v357_v39  ;;  %v58_v55 = vld [vmem:[#allocation2 + $0x48] sm:$0xff]  ;;  %v89_v56 = vld [vmem:[#allocation2 + $0x140] sm:$0xff]  ;;  %v393_v57 = vpack.c.bf16 %v106_v51, %v105_v50  ;;  %v76_v60 = vld [vmem:[#allocation2 + $0xd8] sm:$0xff] }
  0x20   :  { %388 = vmatpush3.bf16.msra.mxu1 %v387_v38  ;;  %v90_v58 = vld [vmem:[#allocation2 + $0x148] sm:$0xff]  ;;  %v107_v62 = vld [vmem:[#allocation2 + $0x1d0] sm:$0xff]  ;;  %v108_v63 = vld [vmem:[#allocation2 + $0x1d8] sm:$0xff]  ;;  %v363_v0 = vpack.c.bf16 %v58_v55, %v57_v54  ;;  %v365_v2 = vpack.c.bf16 %v76_v60, %v75_v59 }
  0x21   :  { %390 = vmatprep.subr.bf16.mxu1 %v389_v43  ;;  %v395_v1 = vpack.c.bf16 %v90_v58, %v89_v56  ;;  %v59_v3 = vld [vmem:[#allocation2 + $0x50] sm:$0xff]  ;;  %v60_v4 = vld [vmem:[#allocation2 + $0x58] sm:$0xff]  ;;  %v397_v6 = vpack.c.bf16 %v108_v63, %v107_v62  ;;  %v77_v8 = vld [vmem:[#allocation2 + $0xe0] sm:$0xff] }
  0x22   :  { %360 = vmatpush3.bf16.msra.mxu0 %v359_v49  ;;  %v91_v5 = vld [vmem:[#allocation2 + $0x150] sm:$0xff]  ;;  %v92_v7 = vld [vmem:[#allocation2 + $0x158] sm:$0xff]  ;;  %v78_v9 = vld [vmem:[#allocation2 + $0xe8] sm:$0xff]  ;;  %v367_v14 = vpack.c.bf16 %v60_v4, %v59_v3 }
  0x23   :  { %362 = vmatprep.subr.bf16.mxu0 %v361_v53  ;;  %v109_v11 = vld [vmem:[#allocation2 + $0x1e0] sm:$0xff]  ;;  %v110_v12 = vld [vmem:[#allocation2 + $0x1e8] sm:$0xff]  ;;  %v399_v17 = vpack.c.bf16 %v92_v7, %v91_v5  ;;  %v369_v18 = vpack.c.bf16 %v78_v9, %v77_v8  ;;  %v79_v23 = vld [vmem:[#allocation2 + $0xf0] sm:$0xff] }
  0x24   :  { %392 = vmatpush3.bf16.msra.mxu1 %v391_v52  ;;  %v61_v15 = vld [vmem:[#allocation2 + $0x60] sm:$0xff]  ;;  %v62_v16 = vld [vmem:[#allocation2 + $0x68] sm:$0xff]  ;;  %v401_v22 = vpack.c.bf16 %v110_v12, %v109_v11  ;;  %v80_v24 = vld [vmem:[#allocation2 + $0xf8] sm:$0xff] }
  0x25   :  { %394 = vmatprep.subr.bf16.mxu1 %v393_v57  ;;  %v93_v19 = vld [vmem:[#allocation2 + $0x160] sm:$0xff]  ;;  %v94_v20 = vld [vmem:[#allocation2 + $0x168] sm:$0xff]  ;;  %v36_v25 = vld [vmem:[%s497_s0 + $0x18] sm:$0xff]  ;;  %v371_v29 = vpack.c.bf16 %v62_v16, %v61_v15  ;;  %v373_v31 = vpack.c.bf16 %v80_v24, %v79_v23 }
  0x26   :  { %364 = vmatpush3.bf16.msra.mxu0 %v363_v0  ;;  %v34_v21 = vld [vmem:[%s497_s0 + $0x8] sm:$0xff]  ;;  %v111_v26 = vld [vmem:[#allocation2 + $0x1f0] sm:$0xff]  ;;  %v112_v27 = vld [vmem:[#allocation2 + $0x1f8] sm:$0xff]  ;;  %vm40_vm1 = vcmp.eq.s32.totalorder %v32_v13, %v36_v25  ;;  %v403_v30 = vpack.c.bf16 %v94_v20, %v93_v19 }
  0x27   :  { %366 = vmatprep.subr.bf16.mxu0 %v365_v2  ;;  %vm38_vm0 = vcmp.eq.s32.totalorder %v30_v10, %v34_v21  ;;  %273 = vmatprep.mubr.msk.f32.mxu1 %vm40_vm1, %v440_v28  ;;  %v63_v32 = vld [vmem:[#allocation2 + $0x70] sm:$0xff]  ;;  %v64_v33 = vld [vmem:[#allocation2 + $0x78] sm:$0xff]  ;;  %v405_v34 = vpack.c.bf16 %v112_v27, %v111_v26  ;;  %v33_v39 = vld [vmem:[%s497_s0] sm:$0xff] }
  0x28   :  { %396 = vmatpush3.bf16.msra.mxu1 %v395_v1  ;;  %271 = vmatprep.mubr.msk.f32.mxu0 %vm38_vm0, %v440_v28  ;;  %v95_v35 = vld [vmem:[#allocation2 + $0x170] sm:$0xff]  ;;  %v96_v36 = vld [vmem:[#allocation2 + $0x178] sm:$0xff]  ;;  %v375_v37 = vpack.c.bf16 %v64_v33, %v63_v32  ;;  %vm37_vm2 = vcmp.eq.s32.totalorder %v473_v61, %v33_v39  ;;  %v270_v43 = vld [vmem:[%s499_s2] ss:$0 sm:$0xff] }
  0x29   :  { %398 = vmatprep.subr.bf16.mxu1 %v397_v6  ;;  %v407_v38 = vpack.c.bf16 %v96_v36, %v95_v35  ;;  %v35_v41 = vld [vmem:[%s497_s0 + $0x10] sm:$0xff] }
  0x2a   :  { %368 = vmatpush3.bf16.msra.mxu0 %v367_v14  ;;  %vm39_vm3 = vcmp.eq.s32.totalorder %v31_v40, %v35_v41 }
  0x2b   :  { %370 = vmatprep.subr.bf16.mxu0 %v369_v18 }
  0x2c   :  { %400 = vmatpush3.bf16.msra.mxu1 %v399_v17 }
  0x2d   :  { %402 = vmatprep.subr.bf16.mxu1 %v401_v22 }
  0x2e   :  { %372 = vmatpush3.bf16.msra.mxu0 %v371_v29 }
  0x2f   :  { %374 = vmatprep.subr.bf16.mxu0 %v373_v31 }
  0x30   :  { %404 = vmatpush3.bf16.msra.mxu1 %v403_v30 }
  0x31   :  { %406 = vmatprep.subr.bf16.mxu1 %v405_v34 }
  0x32   :  { %376 = vmatpush3.bf16.msra.mxu0 %v375_v37 }
  0x34   :  { %408 = vmatpush3.bf16.msra.mxu1 %v407_v38 }
  0x35   :  { %272 = vmatmul.mubr.msk.f32.vlgmr.msra.gmra.mrb[0].mxu0 %vm37_vm2, %v440_v28 }
  0x37   :  { %274 = vmatmul.mubr.msk.f32.vlgmr.msra.gmra.mrb[0].mxu1 %vm39_vm3, %v440_v28 }
 0x108   :  { %v307_v42 = vpop.f32.mrb[0].mxu0 }
 0x109   :  { %v308_v44 = vpop.f32.mrb[1].mxu0 }
 0x10a   :  { %v342_v45 = vpop.f32.mrb[0].mxu1  ;;  %v309_v46 = vadd.f32 %v308_v44, %v307_v42 }
 0x10b   :  { %v343_v47 = vpop.f32.mrb[1].mxu1 }
 0x10c   :  { %v344_v48 = vadd.f32 %v343_v47, %v342_v45  ;;  %v187_v49 = vadd.f32 %v309_v46, %v270_v43 }
 0x10e   :  { %v257_v50 = vadd.f32 %v344_v48, %v187_v49 }
 0x110   :  { %260 = vst [vmem:[%s500_s3] sm:$0xff] %v257_v50 }
 0x111   :  { %265 = vsyncpa [#allocation3], 1 }

</bundles_post_ra>
